<compile_context>
chip_gen: v6e
topology: v6e:2x2x1
jax: 0.10.0
libtpu: 0.0.40
codegen_flags: <defaults>
</compile_context>

<pallas_src>
import functools

import jax
import jax.numpy as jnp
from jax.experimental import pallas as pl
from jax.experimental.pallas import tpu as pltpu


_TILE_B = 128  # batch-row tile: one full MXU pass worth of rows (v5e-friendly)


def _round_up(x, m):
    return ((x + m - 1) // m) * m


def _hyper_kernel(t_ref, small_ref, w2_ref, w3_ref, b3_ref, out_ref):
    # t_ref:     (TILE_B, 1)   time values for this tile of the batch
    # small_ref: (3, H)        rows = [w1 (fc1 weight row), b1, b2]   (resident)
    # w2_ref:    (H, H)        fc2 weight, (in, out) layout            (resident)
    # w3_ref:    (H, O_pad)    fc3 weight, zero-padded to lane-dense   (resident)
    # b3_ref:    (1, O_pad)    fc3 bias, zero-padded                   (resident)
    # out_ref:   (TILE_B, O_pad)
    t = t_ref[...]                                  # (TILE_B, 1)
    w1 = small_ref[0:1, :]                          # (1, H)
    b1 = small_ref[1:2, :]                          # (1, H)
    b2 = small_ref[2:3, :]                          # (1, H)

    # fc1: Linear(1, H) -> tanh.  (TILE_B,1) * (1,H) broadcast == t @ w1.
    h1 = jnp.tanh(t * w1 + b1)                      # (TILE_B, H)

    # fc2: Linear(H, H) -> tanh.
    h2 = jnp.tanh(
        jnp.dot(h1, w2_ref[...], preferred_element_type=jnp.float32) + b2
    )                                               # (TILE_B, H)

    # fc3: Linear(H, O) (no activation); padded columns are exact zeros.
    out_ref[...] = (
        jnp.dot(h2, w3_ref[...], preferred_element_type=jnp.float32) + b3_ref[...]
    )                                               # (TILE_B, O_pad)


class HyperNetwork2:
    """JAX/Pallas port of the PyTorch HyperNetwork2 module."""

    def __init__(self, in_out_dim, hidden_dim, width, key):
        self.in_out_dim = in_out_dim
        self.hidden_dim = hidden_dim
        self.width = width
        self.blocksize = width * in_out_dim
        self.out_dim = 4 * self.blocksize + width          # logical fc3 width (136)
        self.out_pad = _round_up(self.out_dim, 128)         # lane-dense width (256)

        k1, k2, k3, k4, k5, k6 = jax.random.split(key, 6)

        def _linear_init(kw, kb, fan_in, fan_out):
            # Mimic torch.nn.Linear default init: U(-1/sqrt(fan_in), 1/sqrt(fan_in)).
            bound = 1.0 / jnp.sqrt(jnp.float32(fan_in))
            w = jax.random.uniform(kw, (fan_in, fan_out), jnp.float32, -bound, bound)
            b = jax.random.uniform(kb, (1, fan_out), jnp.float32, -bound, bound)
            return w, b

        # Weights stored as (in, out) so the kernel does y = x @ W + b.
        w1, b1 = _linear_init(k1, k2, 1, hidden_dim)             # (1, H), (1, H)
        self.w2, b2 = _linear_init(k3, k4, hidden_dim, hidden_dim)  # (H, H), (1, H)
        w3, b3 = _linear_init(k5, k6, hidden_dim, self.out_dim)     # (H, O), (1, O)

        # Pack the three (1, H) operands into a single resident (3, H) tile.
        self.small = jnp.concatenate([w1, b1, b2], axis=0)          # (3, H)

        # Zero-pad fc3 to a lane-dense output width (store-side lever).
        pad = self.out_pad - self.out_dim
        self.w3 = jnp.pad(w3, ((0, 0), (0, pad)))                   # (H, O_pad)
        self.b3 = jnp.pad(b3, ((0, 0), (0, pad)))                   # (1, O_pad)

    @functools.partial(jax.jit, static_argnums=0)
    def _forward_rows(self, ts):
        """ts: (B,) f32 time values -> (B, out_dim) raw fc3 rows."""
        B = ts.shape[0]
        B_pad = _round_up(B, _TILE_B)
        ts_pad = jnp.zeros((B_pad, 1), jnp.float32).at[:B, 0].set(ts)

        H, O = self.hidden_dim, self.out_pad
        out = pl.pallas_call(
            _hyper_kernel,
            out_shape=jax.ShapeDtypeStruct((B_pad, O), jnp.float32),
            grid=(B_pad // _TILE_B,),
            in_specs=[
                pl.BlockSpec((_TILE_B, 1), lambda i: (i, 0)),   # per-tile t rows
                pl.BlockSpec((3, H), lambda i: (0, 0)),          # resident small pack
                pl.BlockSpec((H, H), lambda i: (0, 0)),          # resident fc2 weight
                pl.BlockSpec((H, O), lambda i: (0, 0)),          # resident fc3 weight
                pl.BlockSpec((1, O), lambda i: (0, 0)),          # resident fc3 bias
            ],
            out_specs=pl.BlockSpec((_TILE_B, O), lambda i: (i, 0)),
            compiler_params=pltpu.CompilerParams(
                dimension_semantics=("parallel",),
            ),
        )(ts_pad, self.small, self.w2, self.w3, self.b3)

        # Drop batch padding and the lane-density padding columns.
        return out[:B, : self.out_dim]

    def __call__(self, t):
        """Torch-equivalent forward for a single scalar t -> [W, W2, B, U]."""
        row = self._forward_rows(jnp.asarray(t, jnp.float32).reshape(1))[0]
        bs, w, d = self.blocksize, self.width, self.in_out_dim
        W = row[:bs].reshape(w, d, 1)
        W2 = row[bs:2 * bs].reshape(w, d, 1)
        U = row[2 * bs:3 * bs].reshape(w, 1, d)
        # NOTE: row[3*bs:4*bs] is intentionally unused (matches the torch code).
        B = row[4 * bs:].reshape(w, 1, 1)
        return [W, W2, B, U]

    def forward_batch(self, ts):
        """Batched forward over many t values (the fast path): returns stacked params."""
        rows = self._forward_rows(jnp.asarray(ts, jnp.float32).reshape(-1))
        n = rows.shape[0]
        bs, w, d = self.blocksize, self.width, self.in_out_dim
        W = rows[:, :bs].reshape(n, w, d, 1)
        W2 = rows[:, bs:2 * bs].reshape(n, w, d, 1)
        U = rows[:, 2 * bs:3 * bs].reshape(n, w, 1, d)
        B = rows[:, 4 * bs:].reshape(n, w, 1, 1)
        return [W, W2, B, U]


def _reference_rows(net: HyperNetwork2, ts):
    """Pure-JAX reference of the same forward pass (raw fc3 rows)."""
    ts = jnp.asarray(ts, jnp.float32).reshape(-1, 1)
    w1, b1, b2 = net.small[0:1, :], net.small[1:2, :], net.small[2:3, :]
    h1 = jnp.tanh(ts @ w1 + b1)
    h2 = jnp.tanh(h1 @ net.w2 + b2)
    return h2 @ net.w3[:, : net.out_dim] + net.b3[:, : net.out_dim]


def _reference_scalar(net: HyperNetwork2, t):
    out = _reference_rows(net, jnp.asarray(t, jnp.float32).reshape(1))[0]
    bs, w, d = net.blocksize, net.width, net.in_out_dim
    return [
        out[:bs].reshape(w, d, 1),
        out[bs:2 * bs].reshape(w, d, 1),
        out[4 * bs:].reshape(w, 1, 1),
        out[2 * bs:3 * bs].reshape(w, 1, d),
    ]


if __name__ == "__main__":
    in_out_dim, hidden_dim, width = 4, 32, 8

    key = jax.random.PRNGKey(0)
    k_param, k_t = jax.random.split(key)
    net = HyperNetwork2(in_out_dim, hidden_dim, width, k_param)

    # --- scalar path: exact torch-forward semantics -------------------------
    t = jax.random.uniform(k_t, (), jnp.float32)
    outs = jax.block_until_ready(net(t))
    refs = _reference_scalar(net, t)
    for o, r in zip(outs, refs):
        assert o.shape == r.shape, (o.shape, r.shape)
        assert jnp.allclose(o, r, atol=1e-5, rtol=1e-5)

    # --- batched path: many t values, grid over 128-row tiles ---------------
    ts = jax.random.uniform(k_t, (200,), jnp.float32)  # non-multiple of 128 on purpose
    Wb, W2b, Bb, Ub = jax.block_until_ready(net.forward_batch(ts))
    ref_rows = _reference_rows(net, ts)
    bs = net.blocksize
    nb = ts.shape[0]
    assert jnp.allclose(Wb, ref_rows[:, :bs].reshape(nb, width, in_out_dim, 1),
                        atol=1e-5, rtol=1e-5)
    assert jnp.allclose(W2b, ref_rows[:, bs:2 * bs].reshape(nb, width, in_out_dim, 1),
                        atol=1e-5, rtol=1e-5)
    assert jnp.allclose(Ub, ref_rows[:, 2 * bs:3 * bs].reshape(nb, width, 1, in_out_dim),
                        atol=1e-5, rtol=1e-5)
    assert jnp.allclose(Bb, ref_rows[:, 4 * bs:].reshape(nb, width, 1, 1),
                        atol=1e-5, rtol=1e-5)

    print("KERNEL_OK")
</pallas_src>

<mosaic_0001>
module attributes {stable_mosaic.version = 11 : i64} {
  func.func @_hyper_kernel(%arg0: i32, %arg1: memref<128x1xf32, #tpu.memory_space<vmem>>, %arg2: memref<3x32xf32, #tpu.memory_space<vmem>>, %arg3: memref<32x32xf32, #tpu.memory_space<vmem>>, %arg4: memref<32x256xf32, #tpu.memory_space<vmem>>, %arg5: memref<1x256xf32, #tpu.memory_space<vmem>>, %arg6: memref<128x256xf32, #tpu.memory_space<vmem>>) attributes {dimension_semantics = [#tpu.dimension_semantics<parallel>], iteration_bounds = array<i64: 1>, scalar_prefetch = 0 : i64, scratch_operands = 0 : i64, tpu.core_type = #tpu.core_type<tc>, window_params = [{transform_indices = @transform_0, window_bounds = array<i64: 128, 1>}, {pipeline_mode = #tpu.pipeline_mode<synchronous>, transform_indices = @transform_1, window_bounds = array<i64: 3, 32>}, {pipeline_mode = #tpu.pipeline_mode<synchronous>, transform_indices = @transform_2, window_bounds = array<i64: 32, 32>}, {pipeline_mode = #tpu.pipeline_mode<synchronous>, transform_indices = @transform_3, window_bounds = array<i64: 32, 256>}, {pipeline_mode = #tpu.pipeline_mode<synchronous>, transform_indices = @transform_4, window_bounds = array<i64: 1, 256>}, {transform_indices = @transform_5, window_bounds = array<i64: 128, 256>}]} {
    %c0 = arith.constant 0 : index
    %c0_0 = arith.constant 0 : index
    %0 = vector.load %arg1[%c0, %c0_0] : memref<128x1xf32, #tpu.memory_space<vmem>>, vector<128x1xf32>
    %c0_1 = arith.constant 0 : index
    %c0_2 = arith.constant 0 : index
    %1 = vector.load %arg2[%c0_1, %c0_2] : memref<3x32xf32, #tpu.memory_space<vmem>>, vector<1x32xf32>
    %c1 = arith.constant 1 : index
    %c0_3 = arith.constant 0 : index
    %2 = vector.load %arg2[%c1, %c0_3] : memref<3x32xf32, #tpu.memory_space<vmem>>, vector<1x32xf32>
    %c2 = arith.constant 2 : index
    %c0_4 = arith.constant 0 : index
    %3 = vector.load %arg2[%c2, %c0_4] : memref<3x32xf32, #tpu.memory_space<vmem>>, vector<1x32xf32>
    %4 = vector.broadcast %0 : vector<128x1xf32> to vector<128x32xf32>
    %5 = vector.broadcast %1 : vector<1x32xf32> to vector<128x32xf32>
    %6 = arith.mulf %4, %5 : vector<128x32xf32>
    %7 = vector.broadcast %2 : vector<1x32xf32> to vector<128x32xf32>
    %8 = arith.addf %6, %7 : vector<128x32xf32>
    %9 = math.tanh %8 : vector<128x32xf32>
    %c0_5 = arith.constant 0 : index
    %c0_6 = arith.constant 0 : index
    %10 = vector.load %arg3[%c0_5, %c0_6] : memref<32x32xf32, #tpu.memory_space<vmem>>, vector<32x32xf32>
    %cst = arith.constant dense<0.000000e+00> : vector<128x32xf32>
    %11 = tpu.matmul %9, %10, %cst {dimension_numbers = #tpu.dot_dimension_numbers<[1], [0], [0], [1], [0, 0, 1, 1], [], []>} : vector<128x32xf32>, vector<32x32xf32>, vector<128x32xf32> -> vector<128x32xf32>
    %12 = vector.broadcast %3 : vector<1x32xf32> to vector<128x32xf32>
    %13 = arith.addf %11, %12 : vector<128x32xf32>
    %14 = math.tanh %13 : vector<128x32xf32>
    %c0_7 = arith.constant 0 : index
    %c0_8 = arith.constant 0 : index
    %15 = vector.load %arg4[%c0_7, %c0_8] : memref<32x256xf32, #tpu.memory_space<vmem>>, vector<32x256xf32>
    %cst_9 = arith.constant dense<0.000000e+00> : vector<128x256xf32>
    %16 = tpu.matmul %14, %15, %cst_9 {dimension_numbers = #tpu.dot_dimension_numbers<[1], [0], [0], [1], [0, 0, 1, 1], [], []>} : vector<128x32xf32>, vector<32x256xf32>, vector<128x256xf32> -> vector<128x256xf32>
    %c0_10 = arith.constant 0 : index
    %c0_11 = arith.constant 0 : index
    %17 = vector.load %arg5[%c0_10, %c0_11] : memref<1x256xf32, #tpu.memory_space<vmem>>, vector<1x256xf32>
    %18 = vector.broadcast %17 : vector<1x256xf32> to vector<128x256xf32>
    %19 = arith.addf %16, %18 : vector<128x256xf32>
    %c0_12 = arith.constant 0 : index
    %c0_13 = arith.constant 0 : index
    %20 = vector.load %arg6[%c0_12, %c0_13] : memref<128x256xf32, #tpu.memory_space<vmem>>, vector<128x256xf32>
    tpu.vector_store %arg6[%c0_12, %c0_13], %19 {strides = array<i32>} : memref<128x256xf32, #tpu.memory_space<vmem>>, vector<128x256xf32>,
    return
  }
  func.func @transform_0(%arg0: i32) -> (i32, i32) {
    %c0_i32 = arith.constant 0 : i32
    %c0_i32_0 = arith.constant 0 : i32
    return %arg0, %c0_i32 : i32, i32
  }
  func.func @transform_1(%arg0: i32) -> (i32, i32) {
    %c0_i32 = arith.constant 0 : i32
    %c0_i32_0 = arith.constant 0 : i32
    %c0_i32_1 = arith.constant 0 : i32
    return %c0_i32, %c0_i32_0 : i32, i32
  }
  func.func @transform_2(%arg0: i32) -> (i32, i32) {
    %c0_i32 = arith.constant 0 : i32
    %c0_i32_0 = arith.constant 0 : i32
    %c0_i32_1 = arith.constant 0 : i32
    return %c0_i32, %c0_i32_0 : i32, i32
  }
  func.func @transform_3(%arg0: i32) -> (i32, i32) {
    %c0_i32 = arith.constant 0 : i32
    %c0_i32_0 = arith.constant 0 : i32
    %c0_i32_1 = arith.constant 0 : i32
    return %c0_i32, %c0_i32_0 : i32, i32
  }
  func.func @transform_4(%arg0: i32) -> (i32, i32) {
    %c0_i32 = arith.constant 0 : i32
    %c0_i32_0 = arith.constant 0 : i32
    %c0_i32_1 = arith.constant 0 : i32
    return %c0_i32, %c0_i32_0 : i32, i32
  }
  func.func @transform_5(%arg0: i32) -> (i32, i32) {
    %c0_i32 = arith.constant 0 : i32
    %c0_i32_0 = arith.constant 0 : i32
    return %arg0, %c0_i32 : i32, i32
  }
}

</mosaic_0001>

<bundles_post_ra>
// kernel: _forward_rows.1
= control target key start
LH: loop header
LB: loop body
LE: loop exit
PB: predicated region body
PF: predicated region fallthrough
CT: control target
= control target key end

     0   :  { %v821_v0 = vmov 0   ;;  %vm183_vm0 = vcmask 261120   ;;  %s1183_s0 = inlined_call_operand.vmem [shape: f32[128,1], index: 0, kind: input, shape index: {}]   ;;  %s1184_s2 = inlined_call_operand.vmem [shape: f32[32,32], index: 2, kind: input, shape index: {}]   ;;  %s1185_s1 = inlined_call_operand.vmem [shape: f32[3,32], index: 1, kind: input, shape index: {}]   ;;  %s1186_s3 = inlined_call_operand.vmem [shape: f32[32,256], index: 3, kind: input, shape index: {}]   ;;  %s1187_s4 = inlined_call_operand.vmem [shape: f32[1,256], index: 4, kind: input, shape index: {}]   ;;  %s1188_s5 = inlined_call_operand.vmem [shape: f32[128,256], index: 5, kind: output, shape index: {}]  }
   0x1   :  { %756 = vset.pattern.permute.xlu1 %v821_v0  ;;  %755 = vset.pattern.permute.xlu0 %v821_v0  ;;  %v22_v1 = vld [vmem:[%s1183_s0 + $0x10] sm:$0xff]  ;;  %v20_v2 = vld [vmem:[%s1183_s0] sm:$0xff]  ;;  %v23_v3 = vld [vmem:[%s1183_s0 + $0x18] sm:$0xff] }
   0x2   :  { %51 = vperm.xlu1 %756, %v22_v1   ;;  %41 = vperm.xlu0 %755, %v20_v2   ;;  %v21_v4 = vld [vmem:[%s1183_s0 + $0x8] sm:$0xff]  ;;  %v24_v6 = vld [vmem:[%s1183_s0 + $0x20] sm:$0xff]  ;;  %v27_v7 = vld [vmem:[%s1183_s0 + $0x38] sm:$0xff] }
   0x3   :  { %v25_v5 = vld [vmem:[%s1183_s0 + $0x28] sm:$0xff]  ;;  %v26_v8 = vld [vmem:[%s1183_s0 + $0x30] sm:$0xff]  ;;  %v178_v9 = vld [vmem:[%s1184_s2 + $0x18] sm:$0xff] }
   0x4   :  { %713 = vmatprep.subr.mxu0 %v178_v9  ;;  %v177_v10 = vld [vmem:[%s1184_s2 + $0x10] sm:$0xff]  ;;  %v29_v11 = vld [vmem:[%s1183_s0 + $0x48] sm:$0xff]  ;;  %v28_v12 = vld [vmem:[%s1183_s0 + $0x40] sm:$0xff] }
   0x5   :  { %714 = vmatpush3.msra.mxu0 %v178_v9  ;;  %v176_v13 = vld [vmem:[%s1184_s2 + $0x8] sm:$0xff]  ;;  %v175_v14 = vld [vmem:[%s1184_s2] sm:$0xff]  ;;  %v31_v15 = vld [vmem:[%s1183_s0 + $0x58] sm:$0xff] }
   0x6   :  { %56 = vperm.xlu1 %756, %v23_v3   ;;  %46 = vperm.xlu0 %755, %v21_v4   ;;  %v30_v16 = vld [vmem:[%s1183_s0 + $0x50] sm:$0xff]  ;;  %v33_v17 = vld [vmem:[%s1183_s0 + $0x68] sm:$0xff]  ;;  %v32_v18 = vld [vmem:[%s1183_s0 + $0x60] sm:$0xff] }
   0x7   :  { %715 = vmatprep.subr.mxu0 %v177_v10  ;;  %v35_v19 = vld [vmem:[%s1183_s0 + $0x78] sm:$0xff]  ;;  %v34_v20 = vld [vmem:[%s1183_s0 + $0x70] sm:$0xff]  ;;  %v916_v21 = vld [vmem:[%s1185_s1] ss:$0 sm:$0xff] }
   0x8   :  { %716 = vmatpush3.msra.mxu0 %v177_v10  ;;  %v921_v22 = vld [vmem:[%s1185_s1 + $0x1] ss:$0 sm:$0xff] }
   0x9   :  { %717 = vmatprep.subr.mxu0 %v176_v13 }
   0xa   :  { %66 = vperm.xlu1 %756, %v25_v5   ;;  %61 = vperm.xlu0 %755, %v24_v6  }
   0xb   :  { %718 = vmatpush3.msra.mxu0 %v176_v13 }
   0xc   :  { %719 = vmatprep.subr.mxu0 %v175_v14 }
   0xd   :  { %720 = vmatpush3.msra.mxu0 %v175_v14 }
   0xe   :  { %76 = vperm.xlu1 %756, %v27_v7   ;;  %71 = vperm.xlu0 %755, %v26_v8  }
  0x12   :  { %86 = vperm.xlu1 %756, %v29_v11   ;;  %81 = vperm.xlu0 %755, %v28_v12  }
  0x16   :  { %96 = vperm.xlu1 %756, %v31_v15   ;;  %91 = vperm.xlu0 %755, %v30_v16  }
  0x1a   :  { %106 = vperm.xlu1 %756, %v33_v17   ;;  %101 = vperm.xlu0 %755, %v32_v18  }
  0x1e   :  { %116 = vperm.xlu1 %756, %v35_v19   ;;  %111 = vperm.xlu0 %755, %v34_v20  }
  0x7d   :  { %v52_v23 = vpop.permute.xlu1 %51  ;;  %v42_v24 = vpop.permute.xlu0 %41 }
  0x7e   :  { %v125_v25 = vmul.f32 %v916_v21, %v52_v23  ;;  %v123_v26 = vmul.f32 %v916_v21, %v42_v24  ;;  %v400_v23 = vld [vmem:[%s1186_s3 + $0x38] sm:$0xff]  ;;  %v399_v24 = vld [vmem:[%s1186_s3 + $0x30] sm:$0xff] }
  0x7f   :  { %485 = vmatprep.subr.mxu0 %v400_v23  ;;  %745 = vmatprep.subr.mxu1 %v400_v23 }
  0x80   :  { %v143_v27 = vadd.f32 %v921_v22, %v123_v26  ;;  %v145_v30 = vadd.f32 %v921_v22, %v125_v25  ;;  %v398_v25 = vld [vmem:[%s1186_s3 + $0x28] sm:$0xff]  ;;  %749 = vmatpush1.msra.mxu1 %v399_v24  ;;  %v397_v26 = vld [vmem:[%s1186_s3 + $0x20] sm:$0xff] }
  0x81   :  { %v57_v28 = vpop.permute.xlu1 %56  ;;  %v47_v29 = vpop.permute.xlu0 %46  ;;  %746 = vmatprep.subr.mxu1 %v398_v25 }
  0x82   :  { %v126_v31 = vmul.f32 %v916_v21, %v57_v28  ;;  %v124_v32 = vmul.f32 %v916_v21, %v47_v29  ;;  %757 = vtanh.f32 %v143_v27  ;;  %v396_v27 = vld [vmem:[%s1186_s3 + $0x18] sm:$0xff]  ;;  %750 = vmatpush1.msra.mxu1 %v397_v26  ;;  %v395_v28 = vld [vmem:[%s1186_s3 + $0x10] sm:$0xff]  ;;  %v394_v29 = vld [vmem:[%s1186_s3 + $0x8] sm:$0xff] }
  0x83   :  { %759 = vtanh.f32 %v145_v30  ;;  %747 = vmatprep.subr.mxu1 %v396_v27  ;;  %v393_v30 = vld [vmem:[%s1186_s3] sm:$0xff] }
  0x84   :  { %v144_v33 = vadd.f32 %v921_v22, %v124_v32  ;;  %v146_v36 = vadd.f32 %v921_v22, %v126_v31  ;;  %751 = vmatpush1.msra.mxu1 %v395_v28  ;;  %v822_v31 = vmov 0.0  }
  0x85   :  { %v67_v34 = vpop.permute.xlu1 %66  ;;  %v62_v35 = vpop.permute.xlu0 %61  ;;  %748 = vmatprep.subr.mxu1 %v394_v29  ;;  %549 = vmatprep.mubr.f32.mxu1 %v822_v31 }
  0x86   :  { %v128_v37 = vmul.f32 %v916_v21, %v67_v34  ;;  %v127_v38 = vmul.f32 %v916_v21, %v62_v35  ;;  %761 = vtanh.f32 %v144_v33  ;;  %752 = vmatpush1.msra.mxu1 %v393_v30  ;;  %v1000_v33 = vld [vmem:[%s1185_s1 + $0x2] ss:$0 sm:$0xff] }
  0x87   :  { %763 = vtanh.f32 %v146_v36 }
  0x88   :  { %v147_v39 = vadd.f32 %v921_v22, %v127_v38  ;;  %v148_v42 = vadd.f32 %v921_v22, %v128_v37 }
  0x89   :  { %v77_v40 = vpop.permute.xlu1 %76  ;;  %v72_v41 = vpop.permute.xlu0 %71 }
  0x8a   :  { %v130_v43 = vmul.f32 %v916_v21, %v77_v40  ;;  %v129_v44 = vmul.f32 %v916_v21, %v72_v41  ;;  %765 = vtanh.f32 %v147_v39 }
  0x8b   :  { %767 = vtanh.f32 %v148_v42 }
  0x8c   :  { %v149_v45 = vadd.f32 %v921_v22, %v129_v44  ;;  %v150_v48 = vadd.f32 %v921_v22, %v130_v43 }
  0x8d   :  { %v87_v46 = vpop.permute.xlu1 %86  ;;  %v82_v47 = vpop.permute.xlu0 %81 }
  0x8e   :  { %v132_v49 = vmul.f32 %v916_v21, %v87_v46  ;;  %v131_v50 = vmul.f32 %v916_v21, %v82_v47  ;;  %769 = vtanh.f32 %v149_v45 }
  0x8f   :  { %v758_v51 = vpop.eup %757  ;;  %771 = vtanh.f32 %v150_v48 }
  0x90   :  { %v151_v52 = vadd.f32 %v921_v22, %v131_v50  ;;  %721 = vmatprep.mubr.msk.f32.mxu0 %vm183_vm0, %v758_v51  ;;  %v152_v55 = vadd.f32 %v921_v22, %v132_v49  ;;  %v760_v58 = vpop.eup %759 }
  0x91   :  { %v97_v53 = vpop.permute.xlu1 %96  ;;  %v92_v54 = vpop.permute.xlu0 %91 }
  0x92   :  { %v134_v56 = vmul.f32 %v916_v21, %v97_v53  ;;  %v133_v57 = vmul.f32 %v916_v21, %v92_v54  ;;  %773 = vtanh.f32 %v151_v52 }
  0x93   :  { %v762_v59 = vpop.eup %761  ;;  %775 = vtanh.f32 %v152_v55 }
  0x94   :  { %v153_v60 = vadd.f32 %v921_v22, %v133_v57  ;;  %722 = vmatmul.mubr.msk.f32.vlgmr.msra.gmra.mxu0 %vm183_vm0, %v762_v59  ;;  %v154_v63 = vadd.f32 %v921_v22, %v134_v56  ;;  %v764_v2 = vpop.eup %763 }
  0x95   :  { %v107_v61 = vpop.permute.xlu1 %106  ;;  %v102_v62 = vpop.permute.xlu0 %101  ;;  %724 = vmatprep.mubr.msk.f32.mxu0 %vm183_vm0, %v760_v58  ;;  %486 = vmatpush1.msra.mxu0 %v399_v24 }
  0x96   :  { %v136_v0 = vmul.f32 %v916_v21, %v107_v61  ;;  %v135_v1 = vmul.f32 %v916_v21, %v102_v62  ;;  %777 = vtanh.f32 %v153_v60  ;;  %487 = vmatprep.subr.mxu0 %v398_v25 }
  0x97   :  { %v766_v3 = vpop.eup %765  ;;  %779 = vtanh.f32 %v154_v63  ;;  %488 = vmatpush1.msra.mxu0 %v397_v26 }
  0x98   :  { %v155_v4 = vadd.f32 %v921_v22, %v135_v1  ;;  %725 = vmatmul.mubr.msk.f32.gmra.mxu0 %vm183_vm0, %v764_v2  ;;  %v156_v7 = vadd.f32 %v921_v22, %v136_v0  ;;  %v768_v9 = vpop.eup %767  ;;  %489 = vmatprep.subr.mxu0 %v396_v27 }
  0x99   :  { %v117_v5 = vpop.permute.xlu1 %116  ;;  %v112_v6 = vpop.permute.xlu0 %111  ;;  %727 = vmatprep.mubr.msk.f32.mxu0 %vm183_vm0, %v766_v3  ;;  %490 = vmatpush1.msra.mxu0 %v395_v28 }
  0x9a   :  { %v137_v8 = vmul.f32 %v916_v21, %v112_v6  ;;  %781 = vtanh.f32 %v155_v4  ;;  %v138_v10 = vmul.f32 %v916_v21, %v117_v5  ;;  %491 = vmatprep.subr.mxu0 %v394_v29 }
  0x9b   :  { %v770_v11 = vpop.eup %769  ;;  %783 = vtanh.f32 %v156_v7  ;;  %492 = vmatpush1.msra.mxu0 %v393_v30 }
  0x9c   :  { %v157_v12 = vadd.f32 %v921_v22, %v137_v8  ;;  %728 = vmatmul.mubr.msk.f32.gmra.mxu0 %vm183_vm0, %v768_v9  ;;  %v772_v13 = vpop.eup %771  ;;  %v158_v14 = vadd.f32 %v921_v22, %v138_v10 }
  0x9d   :  { %730 = vmatprep.mubr.msk.f32.mxu0 %vm183_vm0, %v770_v11 }
  0x9e   :  { %785 = vtanh.f32 %v157_v12 }
  0x9f   :  { %v774_v15 = vpop.eup %773  ;;  %787 = vtanh.f32 %v158_v14 }
  0xa0   :  { %731 = vmatmul.mubr.msk.f32.gmra.mxu0 %vm183_vm0, %v772_v13  ;;  %v776_v16 = vpop.eup %775 }
  0xa1   :  { %733 = vmatprep.mubr.msk.f32.mxu0 %vm183_vm0, %v774_v15 }
  0xa3   :  { %v778_v17 = vpop.eup %777 }
  0xa4   :  { %734 = vmatmul.mubr.msk.f32.gmra.mxu0 %vm183_vm0, %v776_v16  ;;  %v780_v18 = vpop.eup %779 }
  0xa5   :  { %736 = vmatprep.mubr.msk.f32.mxu0 %vm183_vm0, %v778_v17  ;;  %v403_v17 = vlaneseq }
  0xa7   :  { %v782_v19 = vpop.eup %781 }
  0xa8   :  { %737 = vmatmul.mubr.msk.f32.gmra.mxu0 %vm183_vm0, %v780_v18  ;;  %v784_v20 = vpop.eup %783  ;;  %v404_v18 = vshrl.u32 %v403_v17, 7 }
  0xa9   :  { %739 = vmatprep.mubr.msk.f32.mxu0 %vm183_vm0, %v782_v19 }
  0xaa   :  { %v405_v19 = vsub.s32 0, %v404_v18 }
  0xab   :  { %v786_v21 = vpop.eup %785 }
  0xac   :  { %740 = vmatmul.mubr.msk.f32.gmra.mxu0 %vm183_vm0, %v784_v20  ;;  %v788_v22 = vpop.eup %787  ;;  %v401_v20 = vld [vmem:[%s1187_s4] sm:$0x3] }
  0xad   :  { %742 = vmatprep.mubr.msk.f32.mxu0 %vm183_vm0, %v786_v21  ;;  %v409_v21 = vsub.s32 1, %v404_v18 }
  0xaf   :  { %v1053_v23 = vrot.slane %v401_v20, %v409_v21 }
  0xb0   :  { %743 = vmatmul.mubr.msk.f32.gmra.mxu0 %vm183_vm0, %v788_v22  ;;  %v1051_v22 = vrot.slane %v401_v20, %v405_v19 }
  0xb1   :  { %525 = vmatprep.mubr.f32.mxu0 %v822_v31 }
 0x154   :  { %v723_v32 = vpop.f32.mrf.mxu0 }
 0x155   :  { %v304_v37 = vadd.f32 %v723_v32, %v1000_v33 }
 0x156   :  { %v298_v34 = vpop.f32.mrf.mxu0 }
 0x157   :  { %v299_v35 = vadd.f32 %v1000_v33, %v298_v34 }
 0x158   :  { %v726_v36 = vpop.f32.mrf.mxu0 }
 0x159   :  { %789 = vtanh.f32 %v299_v35  ;;  %v314_v43 = vadd.f32 %v726_v36, %v1000_v33 }
 0x15a   :  { %v308_v38 = vpop.f32.mrf.mxu0  ;;  %791 = vtanh.f32 %v304_v37 }
 0x15b   :  { %v309_v39 = vadd.f32 %v1000_v33, %v308_v38 }
 0x15c   :  { %v729_v40 = vpop.f32.mrf.mxu0 }
 0x15d   :  { %793 = vtanh.f32 %v309_v39  ;;  %v324_v45 = vadd.f32 %v729_v40, %v1000_v33 }
 0x15e   :  { %v318_v41 = vpop.f32.mrf.mxu0 }
 0x15f   :  { %v319_v42 = vadd.f32 %v1000_v33, %v318_v41 }
 0x160   :  { %v732_v44 = vpop.f32.mrf.mxu0 }
 0x161   :  { %795 = vtanh.f32 %v319_v42  ;;  %v334_v50 = vadd.f32 %v732_v44, %v1000_v33 }
 0x162   :  { %v328_v46 = vpop.f32.mrf.mxu0  ;;  %797 = vtanh.f32 %v314_v43 }
 0x163   :  { %799 = vtanh.f32 %v324_v45  ;;  %v329_v47 = vadd.f32 %v1000_v33, %v328_v46 }
 0x164   :  { %v735_v49 = vpop.f32.mrf.mxu0 }
 0x165   :  { %801 = vtanh.f32 %v329_v47  ;;  %v344_v58 = vadd.f32 %v735_v49, %v1000_v33 }
 0x166   :  { %v790_v48 = vpop.eup %789  ;;  %v338_v52 = vpop.f32.mrf.mxu0  ;;  %803 = vtanh.f32 %v334_v50 }
 0x167   :  { %677 = vmatmul.mubr.msk.f32.vlgmr.msra.gmra.mxu0 %vm183_vm0, %v790_v48  ;;  %v792_v51 = vpop.eup %791  ;;  %v339_v54 = vadd.f32 %v1000_v33, %v338_v52 }
 0x168   :  { %531 = vmatprep.mubr.f32.mxu0 %v822_v31  ;;  %v738_v56 = vpop.f32.mrf.mxu0 }
 0x169   :  { %805 = vtanh.f32 %v339_v54  ;;  %v354_v0 = vadd.f32 %v738_v56, %v1000_v33 }
 0x16a   :  { %v794_v53 = vpop.eup %793  ;;  %v348_v60 = vpop.f32.mrf.mxu0  ;;  %807 = vtanh.f32 %v344_v58 }
 0x16b   :  { %678 = vmatmul.mubr.msk.f32.gmra.mxu0 %vm183_vm0, %v792_v51  ;;  %v349_v61 = vadd.f32 %v1000_v33, %v348_v60 }
 0x16c   :  { %537 = vmatprep.mubr.f32.mxu0 %v822_v31  ;;  %v741_v63 = vpop.f32.mrf.mxu0 }
 0x16d   :  { %809 = vtanh.f32 %v349_v61  ;;  %v364_v6 = vadd.f32 %v741_v63, %v1000_v33 }
 0x16e   :  { %v796_v55 = vpop.eup %795  ;;  %v358_v2 = vpop.f32.mrf.mxu0  ;;  %811 = vtanh.f32 %v354_v0 }
 0x16f   :  { %679 = vmatmul.mubr.msk.f32.gmra.mxu0 %vm183_vm0, %v794_v53  ;;  %681 = vmatmul.mubr.msk.f32.vlgmr.msra.gmra.mxu1 %vm183_vm0, %v796_v55  ;;  %v798_v57 = vpop.eup %797  ;;  %v359_v3 = vadd.f32 %v1000_v33, %v358_v2 }
 0x170   :  { %543 = vmatprep.mubr.f32.mxu0 %v822_v31  ;;  %555 = vmatprep.mubr.f32.mxu1 %v822_v31  ;;  %v800_v59 = vpop.eup %799  ;;  %v744_v5 = vpop.f32.mrf.mxu0 }
 0x171   :  { %813 = vtanh.f32 %v359_v3  ;;  %v374_v11 = vadd.f32 %v744_v5, %v1000_v33 }
 0x172   :  { %v802_v62 = vpop.eup %801  ;;  %v368_v8 = vpop.f32.mrf.mxu0  ;;  %815 = vtanh.f32 %v364_v6 }
 0x173   :  { %680 = vmatmul.mubr.msk.f32.gmra.mxu0 %vm183_vm0, %v798_v57  ;;  %682 = vmatmul.mubr.msk.f32.gmra.mxu1 %vm183_vm0, %v800_v59  ;;  %v804_v1 = vpop.eup %803  ;;  %v369_v9 = vadd.f32 %v1000_v33, %v368_v8 }
 0x174   :  { %561 = vmatprep.mubr.f32.mxu1 %v822_v31 }
 0x175   :  { %817 = vtanh.f32 %v369_v9 }
 0x176   :  { %v806_v4 = vpop.eup %805  ;;  %819 = vtanh.f32 %v374_v11 }
 0x177   :  { %683 = vmatmul.mubr.msk.f32.gmra.mxu1 %vm183_vm0, %v802_v62  ;;  %v808_v7 = vpop.eup %807 }
 0x178   :  { %567 = vmatprep.mubr.f32.mxu1 %v822_v31 }
 0x17a   :  { %v810_v10 = vpop.eup %809 }
 0x17b   :  { %684 = vmatmul.mubr.msk.f32.gmra.mxu1 %vm183_vm0, %v804_v1  ;;  %v812_v12 = vpop.eup %811 }
 0x17c   :  { %573 = vmatprep.mubr.f32.mxu1 %v822_v31 }
 0x17e   :  { %v814_v13 = vpop.eup %813 }
 0x17f   :  { %685 = vmatmul.mubr.msk.f32.gmra.mxu1 %vm183_vm0, %v806_v4  ;;  %v816_v14 = vpop.eup %815 }
 0x180   :  { %579 = vmatprep.mubr.f32.mxu1 %v822_v31 }
 0x182   :  { %v818_v15 = vpop.eup %817 }
 0x183   :  { %686 = vmatmul.mubr.msk.f32.gmra.mxu1 %vm183_vm0, %v808_v7  ;;  %v820_v16 = vpop.eup %819 }
 0x184   :  { %585 = vmatprep.mubr.f32.mxu1 %v822_v31 }
 0x187   :  { %687 = vmatmul.mubr.msk.f32.gmra.mxu1 %vm183_vm0, %v810_v10 }
 0x188   :  { %591 = vmatprep.mubr.f32.mxu1 %v822_v31 }
 0x18b   :  { %688 = vmatmul.mubr.msk.f32.gmra.mxu1 %vm183_vm0, %v812_v12 }
 0x18c   :  { %597 = vmatprep.mubr.f32.mxu1 %v822_v31 }
 0x18f   :  { %689 = vmatmul.mubr.msk.f32.gmra.mxu1 %vm183_vm0, %v814_v13 }
 0x190   :  { %603 = vmatprep.mubr.f32.mxu1 %v822_v31 }
 0x193   :  { %690 = vmatmul.mubr.msk.f32.gmra.mxu1 %vm183_vm0, %v816_v14 }
 0x194   :  { %609 = vmatprep.mubr.f32.mxu1 %v822_v31 }
 0x197   :  { %691 = vmatmul.mubr.msk.f32.gmra.mxu1 %vm183_vm0, %v818_v15 }
 0x198   :  { %615 = vmatprep.mubr.f32.mxu1 %v822_v31 }
 0x19b   :  { %692 = vmatmul.mubr.msk.f32.gmra.mxu1 %vm183_vm0, %v820_v16 }
 0x227   :  { %v527_v24 = vpop.f32.mrf.mxu0 }
 0x228   :  { %v528_v25 = vadd.f32 %v527_v24, %v1051_v22 }
 0x229   :  { %v529_v26 = vpop.f32.mrf.mxu0 }
 0x22a   :  { %622 = vst [vmem:[%s1188_s5] sm:$0xff] %v528_v25  ;;  %v530_v27 = vadd.f32 %v529_v26, %v1053_v23 }
 0x22b   :  { %v533_v28 = vpop.f32.mrf.mxu0 }
 0x22c   :  { %623 = vst [vmem:[%s1188_s5 + $0x8] sm:$0xff] %v530_v27  ;;  %v534_v29 = vadd.f32 %v533_v28, %v1051_v22 }
 0x22d   :  { %v535_v30 = vpop.f32.mrf.mxu0 }
 0x22e   :  { %624 = vst [vmem:[%s1188_s5 + $0x10] sm:$0xff] %v534_v29  ;;  %v536_v31 = vadd.f32 %v535_v30, %v1053_v23 }
 0x22f   :  { %v539_v32 = vpop.f32.mrf.mxu0  ;;  %v551_v33 = vpop.f32.mrf.mxu1 }
 0x230   :  { %625 = vst [vmem:[%s1188_s5 + $0x18] sm:$0xff] %v536_v31  ;;  %v540_v34 = vadd.f32 %v539_v32, %v1051_v22  ;;  %v552_v35 = vadd.f32 %v551_v33, %v1051_v22 }
 0x231   :  { %v541_v36 = vpop.f32.mrf.mxu0  ;;  %v553_v37 = vpop.f32.mrf.mxu1 }
 0x232   :  { %626 = vst [vmem:[%s1188_s5 + $0x20] sm:$0xff] %v540_v34  ;;  %630 = vst [vmem:[%s1188_s5 + $0x40] sm:$0xff] %v552_v35  ;;  %v542_v38 = vadd.f32 %v541_v36, %v1053_v23  ;;  %v554_v39 = vadd.f32 %v553_v37, %v1053_v23 }
 0x233   :  { %v545_v40 = vpop.f32.mrf.mxu0  ;;  %v557_v41 = vpop.f32.mrf.mxu1 }
 0x234   :  { %627 = vst [vmem:[%s1188_s5 + $0x28] sm:$0xff] %v542_v38  ;;  %631 = vst [vmem:[%s1188_s5 + $0x48] sm:$0xff] %v554_v39  ;;  %v546_v42 = vadd.f32 %v545_v40, %v1051_v22  ;;  %v558_v43 = vadd.f32 %v557_v41, %v1051_v22 }
 0x235   :  { %v547_v44 = vpop.f32.mrf.mxu0  ;;  %v559_v45 = vpop.f32.mrf.mxu1 }
 0x236   :  { %628 = vst [vmem:[%s1188_s5 + $0x30] sm:$0xff] %v546_v42  ;;  %632 = vst [vmem:[%s1188_s5 + $0x50] sm:$0xff] %v558_v43  ;;  %v548_v46 = vadd.f32 %v547_v44, %v1053_v23  ;;  %v560_v47 = vadd.f32 %v559_v45, %v1053_v23 }
 0x237   :  { %v563_v48 = vpop.f32.mrf.mxu1 }
 0x238   :  { %629 = vst [vmem:[%s1188_s5 + $0x38] sm:$0xff] %v548_v46  ;;  %633 = vst [vmem:[%s1188_s5 + $0x58] sm:$0xff] %v560_v47  ;;  %v564_v49 = vadd.f32 %v563_v48, %v1051_v22 }
 0x239   :  { %v565_v50 = vpop.f32.mrf.mxu1 }
 0x23a   :  { %634 = vst [vmem:[%s1188_s5 + $0x60] sm:$0xff] %v564_v49  ;;  %v566_v51 = vadd.f32 %v565_v50, %v1053_v23 }
 0x23b   :  { %v569_v52 = vpop.f32.mrf.mxu1 }
 0x23c   :  { %635 = vst [vmem:[%s1188_s5 + $0x68] sm:$0xff] %v566_v51  ;;  %v570_v53 = vadd.f32 %v569_v52, %v1051_v22 }
 0x23d   :  { %v571_v54 = vpop.f32.mrf.mxu1 }
 0x23e   :  { %636 = vst [vmem:[%s1188_s5 + $0x70] sm:$0xff] %v570_v53  ;;  %v572_v55 = vadd.f32 %v571_v54, %v1053_v23 }
 0x23f   :  { %v575_v56 = vpop.f32.mrf.mxu1 }
 0x240   :  { %637 = vst [vmem:[%s1188_s5 + $0x78] sm:$0xff] %v572_v55  ;;  %v576_v57 = vadd.f32 %v575_v56, %v1051_v22 }
 0x241   :  { %v577_v58 = vpop.f32.mrf.mxu1 }
 0x242   :  { %638 = vst [vmem:[%s1188_s5 + $0x80] sm:$0xff] %v576_v57  ;;  %v578_v59 = vadd.f32 %v577_v58, %v1053_v23 }
 0x243   :  { %v581_v60 = vpop.f32.mrf.mxu1 }
 0x244   :  { %639 = vst [vmem:[%s1188_s5 + $0x88] sm:$0xff] %v578_v59  ;;  %v582_v61 = vadd.f32 %v581_v60, %v1051_v22 }
 0x245   :  { %v583_v62 = vpop.f32.mrf.mxu1 }
 0x246   :  { %640 = vst [vmem:[%s1188_s5 + $0x90] sm:$0xff] %v582_v61  ;;  %v584_v63 = vadd.f32 %v583_v62, %v1053_v23 }
 0x247   :  { %v587_v0 = vpop.f32.mrf.mxu1 }
 0x248   :  { %641 = vst [vmem:[%s1188_s5 + $0x98] sm:$0xff] %v584_v63  ;;  %v588_v1 = vadd.f32 %v587_v0, %v1051_v22 }
 0x249   :  { %v589_v2 = vpop.f32.mrf.mxu1 }
 0x24a   :  { %642 = vst [vmem:[%s1188_s5 + $0xa0] sm:$0xff] %v588_v1  ;;  %v590_v3 = vadd.f32 %v589_v2, %v1053_v23 }
 0x24b   :  { %v593_v4 = vpop.f32.mrf.mxu1 }
 0x24c   :  { %643 = vst [vmem:[%s1188_s5 + $0xa8] sm:$0xff] %v590_v3  ;;  %v594_v5 = vadd.f32 %v593_v4, %v1051_v22 }
 0x24d   :  { %v595_v6 = vpop.f32.mrf.mxu1 }
 0x24e   :  { %644 = vst [vmem:[%s1188_s5 + $0xb0] sm:$0xff] %v594_v5  ;;  %v596_v7 = vadd.f32 %v595_v6, %v1053_v23 }
 0x24f   :  { %v599_v8 = vpop.f32.mrf.mxu1 }
 0x250   :  { %645 = vst [vmem:[%s1188_s5 + $0xb8] sm:$0xff] %v596_v7  ;;  %v600_v9 = vadd.f32 %v599_v8, %v1051_v22 }
 0x251   :  { %v601_v10 = vpop.f32.mrf.mxu1 }
 0x252   :  { %646 = vst [vmem:[%s1188_s5 + $0xc0] sm:$0xff] %v600_v9  ;;  %v602_v11 = vadd.f32 %v601_v10, %v1053_v23 }
 0x253   :  { %v605_v12 = vpop.f32.mrf.mxu1 }
 0x254   :  { %647 = vst [vmem:[%s1188_s5 + $0xc8] sm:$0xff] %v602_v11  ;;  %v606_v13 = vadd.f32 %v605_v12, %v1051_v22 }
 0x255   :  { %v607_v14 = vpop.f32.mrf.mxu1 }
 0x256   :  { %648 = vst [vmem:[%s1188_s5 + $0xd0] sm:$0xff] %v606_v13  ;;  %v608_v15 = vadd.f32 %v607_v14, %v1053_v23 }
 0x257   :  { %v611_v16 = vpop.f32.mrf.mxu1 }
 0x258   :  { %649 = vst [vmem:[%s1188_s5 + $0xd8] sm:$0xff] %v608_v15  ;;  %v612_v17 = vadd.f32 %v611_v16, %v1051_v22 }
 0x259   :  { %v613_v18 = vpop.f32.mrf.mxu1 }
 0x25a   :  { %650 = vst [vmem:[%s1188_s5 + $0xe0] sm:$0xff] %v612_v17  ;;  %v614_v19 = vadd.f32 %v613_v18, %v1053_v23 }
 0x25b   :  { %v617_v20 = vpop.f32.mrf.mxu1 }
 0x25c   :  { %651 = vst [vmem:[%s1188_s5 + $0xe8] sm:$0xff] %v614_v19  ;;  %v618_v21 = vadd.f32 %v617_v20, %v1051_v22 }
 0x25d   :  { %v619_v24 = vpop.f32.mrf.mxu1 }
 0x25e   :  { %652 = vst [vmem:[%s1188_s5 + $0xf0] sm:$0xff] %v618_v21  ;;  %v620_v25 = vadd.f32 %v619_v24, %v1053_v23 }
 0x260   :  { %653 = vst [vmem:[%s1188_s5 + $0xf8] sm:$0xff] %v620_v25 }

</bundles_post_ra>
